<compile_context>
chip_gen: v7x
topology: tpu7x:2x2x1
jax: 0.10.0
libtpu: 0.0.40
codegen_flags: <defaults>
</compile_context>

<pallas_src>
import jax
import jax.numpy as jnp
from jax import lax
from jax.experimental import pallas as pl
from jax.experimental.pallas import tpu as pltpu


def _vmem_capacity_bytes():
    try:
        return int(pltpu.get_tpu_info().vmem_capacity_bytes)
    except Exception:
        return 64 * 1024 * 1024  # conservative (v7x-sized) fallback


def _pick_block(B, D, feat_bytes, vmem_budget):
    """Largest square tile dividing B, preferring 128-multiples, that fits the
    VMEM budget (double-buffered feature tiles + f32 logits temporaries)."""
    def fits(blk):
        feat = 2 * 2 * blk * D * feat_bytes      # img + txt tiles, double-buffered
        logit_tmp = 3 * blk * blk * 4            # f32 logits + softplus temporaries
        acc = blk * 128 * 4                      # vector accumulator
        return feat + logit_tmp + acc <= vmem_budget

    for blk in (2048, 1024, 512, 256, 128):      # lane/MXU-aligned candidates
        if blk <= B and B % blk == 0 and fits(blk):
            return blk
    for blk in (64, 32, 16, 8):                  # small-batch fallback
        if blk <= B and B % blk == 0:
            return blk
    return B


def _siglip_kernel(sb_ref, img_ref, txt_ref, out_ref, acc_ref):
    """One (row-block i, col-block j) tile of the SigLIP loss.

    acc_ref : (block_b, lane_w) f32 partial sums for row-block i, carried
              across the j ("arbitrary") reduction axis.
    out_ref : (8, lane_w) f32 per-row-block partial, written once at j == last.
    """
    i = pl.program_id(0)
    j = pl.program_id(1)
    n_j = pl.num_programs(1)

    block_b = img_ref.shape[0]
    lane_w = acc_ref.shape[1]

    @pl.when(j == 0)
    def _init():
        acc_ref[...] = jnp.zeros_like(acc_ref)

    scale = sb_ref[0]
    bias = sb_ref[1]

    # One MXU matmul per tile, contracting on D (no operand transpose,
    # native dtype inputs, f32 accumulation).
    logits = lax.dot_general(
        img_ref[...],
        txt_ref[...],
        dimension_numbers=(((1,), (1,)), ((), ())),
        preferred_element_type=jnp.float32,
    )
    logits = scale * logits + bias

    # Numerically stable softplus(z) = log1p(exp(-|z|)) + max(z, 0).
    sp = jnp.log1p(jnp.exp(-jnp.abs(logits))) + jnp.maximum(logits, 0.0)

    # Diagonal (label = +1) correction folded into the same pass:
    #   -logsigmoid(+z) = softplus(z) - z  =>  subtract z on global-diagonal
    # elements, which on a diagonal tile (i == j) are exactly the local
    # diagonal.  Branch-free compare/select on data already in vregs.
    rows = lax.broadcasted_iota(jnp.int32, logits.shape, 0)
    cols = lax.broadcasted_iota(jnp.int32, logits.shape, 1)
    diag = (rows == cols).astype(jnp.float32) * (i == j).astype(jnp.float32)
    contrib = sp - diag * logits

    # Vreg-shaped accumulation: lane-axis reshape keeps the minor dim at 128,
    # so the partial sum is pure VALU vreg adds (no XLU cross-lane reduce).
    if block_b % 128 == 0:
        acc_ref[...] += contrib.reshape(block_b, block_b // 128, 128).sum(axis=1)
    else:  # small-batch fallback: lane_w == block_b, accumulate directly
        acc_ref[...] += contrib

    @pl.when(j == n_j - 1)
    def _finalize():
        if block_b % 8 == 0:
            # Sublane-tile fold (block_b, lane_w) -> (8, lane_w): VALU adds.
            out_ref[...] = acc_ref[...].reshape(block_b // 8, 8, lane_w).sum(axis=0)
        else:
            col = acc_ref[...].sum(axis=0, keepdims=True)          # (1, lane_w)
            rid = lax.broadcasted_iota(jnp.int32, (8, lane_w), 0)
            out_ref[...] = jnp.where(rid == 0, col, 0.0)


def siglip_loss(image_features, text_features, logit_scale, logit_bias=0.0, *,
                block_b=None):
    """Pallas SigLIP loss forward (world_size == 1). Returns a scalar f32."""
    B, D = image_features.shape
    assert text_features.shape == (B, D)

    # Generation-aware VMEM limit (v5e/v6e: 128 MiB physical, v7x: 64 MiB/TC).
    vmem_cap = _vmem_capacity_bytes()
    vmem_limit = min((vmem_cap * 3) // 4, 96 * 1024 * 1024)

    feat_bytes = max(image_features.dtype.itemsize, text_features.dtype.itemsize)
    if block_b is None:
        block_b = _pick_block(B, D, feat_bytes, (vmem_limit * 4) // 5)
    assert B % block_b == 0, "batch must be divisible by block_b"
    n_blk = B // block_b
    lane_w = 128 if block_b % 128 == 0 else block_b

    sb = jnp.stack([jnp.asarray(logit_scale, jnp.float32),
                    jnp.asarray(logit_bias, jnp.float32)])

    grid_spec = pltpu.PrefetchScalarGridSpec(
        num_scalar_prefetch=1,
        grid=(n_blk, n_blk),
        in_specs=[
            pl.BlockSpec((block_b, D), lambda i, j, sb: (i, 0)),  # image rows
            pl.BlockSpec((block_b, D), lambda i, j, sb: (j, 0)),  # text  cols
        ],
        # Lane-dense per-row-block partials; block index depends only on i, so
        # the i axis can be "parallel" (megacore) and j is the reduction axis.
        out_specs=pl.BlockSpec((8, lane_w), lambda i, j, sb: (i, 0)),
        scratch_shapes=[pltpu.VMEM((block_b, lane_w), jnp.float32)],
    )

    partials = pl.pallas_call(
        _siglip_kernel,
        grid_spec=grid_spec,
        out_shape=jax.ShapeDtypeStruct((n_blk * 8, lane_w), jnp.float32),
        compiler_params=pltpu.CompilerParams(
            dimension_semantics=("parallel", "arbitrary"),
            vmem_limit_bytes=vmem_limit,
        ),
    )(sb, image_features, text_features)

    return jnp.sum(partials) / B


def siglip_loss_ref(image_features, text_features, logit_scale, logit_bias=0.0):
    """Pure-JAX reference mirroring the PyTorch SigLipLoss forward."""
    img = image_features.astype(jnp.float32)
    txt = text_features.astype(jnp.float32)
    logits = logit_scale * img @ txt.T + logit_bias
    B = logits.shape[0]
    labels = 2.0 * jnp.eye(B, dtype=jnp.float32) - 1.0
    return -jnp.sum(jax.nn.log_sigmoid(labels * logits)) / B


if __name__ == "__main__":
    def make_inputs(B, D, key):
        k_img, k_txt = jax.random.split(key)
        img = jax.random.normal(k_img, (B, D), dtype=jnp.float32)
        txt = jax.random.normal(k_txt, (B, D), dtype=jnp.float32)
        img /= jnp.linalg.norm(img, axis=-1, keepdims=True)
        txt /= jnp.linalg.norm(txt, axis=-1, keepdims=True)
        return img, txt

    k0, k1 = jax.random.split(jax.random.PRNGKey(0))
    # Typical SigLIP temperature / bias, deterministic.
    logit_scale = jnp.float32(10.0)
    logit_bias = jnp.float32(-10.0)

    # 1) Small-batch fallback path: block_b=8 -> 2x2 grid (diag + off-diag).
    img, txt = make_inputs(16, 32, k0)
    loss = siglip_loss(img, txt, logit_scale, logit_bias, block_b=8)
    jax.block_until_ready(loss)
    ref = siglip_loss_ref(img, txt, logit_scale, logit_bias)
    assert jnp.allclose(loss, ref, rtol=1e-5, atol=1e-4), (loss, ref)

    # 2) Lane-aligned main path: block_b=128 -> 2x2 grid, vector accumulator.
    img2, txt2 = make_inputs(256, 64, k1)
    loss2 = siglip_loss(img2, txt2, logit_scale, logit_bias, block_b=128)
    jax.block_until_ready(loss2)
    ref2 = siglip_loss_ref(img2, txt2, logit_scale, logit_bias)
    assert jnp.allclose(loss2, ref2, rtol=1e-5, atol=1e-4), (loss2, ref2)

    # 3) Auto (VMEM-budget-derived) tiling on the same data.
    loss3 = siglip_loss(img2, txt2, logit_scale, logit_bias)
    jax.block_until_ready(loss3)
    assert jnp.allclose(loss3, ref2, rtol=1e-5, atol=1e-4), (loss3, ref2)

    print("KERNEL_OK")
</pallas_src>

<mosaic_0001>
module attributes {stable_mosaic.version = 11 : i64} {
  func.func @_siglip_kernel(%arg0: i32, %arg1: i32, %arg2: memref<2xf32, #tpu.memory_space<smem>>, %arg3: memref<8x32xf32, #tpu.memory_space<vmem>>, %arg4: memref<8x32xf32, #tpu.memory_space<vmem>>, %arg5: memref<8x8xf32, #tpu.memory_space<vmem>>, %arg6: memref<8x8xf32, #tpu.memory_space<vmem>>) attributes {dimension_semantics = [#tpu.dimension_semantics<parallel>, #tpu.dimension_semantics<arbitrary>], iteration_bounds = array<i64: 2, 2>, scalar_prefetch = 1 : i64, scratch_operands = 1 : i64, tpu.core_type = #tpu.core_type<tc>, window_params = [{transform_indices = @transform_0, window_bounds = array<i64: 8, 32>}, {transform_indices = @transform_1, window_bounds = array<i64: 8, 32>}, {transform_indices = @transform_2, window_bounds = array<i64: 8, 8>}]} {
    %c0_i32 = arith.constant 0 : i32
    %0 = arith.cmpi eq, %arg1, %c0_i32 : i32
    %1 = arith.extui %0 : i1 to i32
    %c0_i32_0 = arith.constant 0 : i32
    %2 = arith.cmpi ne, %1, %c0_i32_0 : i32
    scf.if %2 {
      %cst_12 = arith.constant 0.000000e+00 : f32
      %38 = vector.broadcast %cst_12 : f32 to vector<8x8xf32>
      %c0_13 = arith.constant 0 : index
      %c0_14 = arith.constant 0 : index
      %39 = vector.load %arg6[%c0_13, %c0_14] : memref<8x8xf32, #tpu.memory_space<vmem>>, vector<8x8xf32>
      tpu.vector_store %arg6[%c0_13, %c0_14], %38 {strides = array<i32>} : memref<8x8xf32, #tpu.memory_space<vmem>>, vector<8x8xf32>,
    } else {
    }
    %c0 = arith.constant 0 : index
    %3 = memref.load %arg2[%c0] : memref<2xf32, #tpu.memory_space<smem>>
    %c1 = arith.constant 1 : index
    %4 = memref.load %arg2[%c1] : memref<2xf32, #tpu.memory_space<smem>>
    %c0_1 = arith.constant 0 : index
    %c0_2 = arith.constant 0 : index
    %5 = vector.load %arg3[%c0_1, %c0_2] : memref<8x32xf32, #tpu.memory_space<vmem>>, vector<8x32xf32>
    %c0_3 = arith.constant 0 : index
    %c0_4 = arith.constant 0 : index
    %6 = vector.load %arg4[%c0_3, %c0_4] : memref<8x32xf32, #tpu.memory_space<vmem>>, vector<8x32xf32>
    %cst = arith.constant dense<0.000000e+00> : vector<8x8xf32>
    %7 = tpu.matmul %5, %6, %cst {dimension_numbers = #tpu.dot_dimension_numbers<[1], [1], [0], [0], [0, 0, 1, 0], [], []>} : vector<8x32xf32>, vector<8x32xf32>, vector<8x8xf32> -> vector<8x8xf32>
    %8 = vector.broadcast %3 : f32 to vector<8x8xf32>
    %9 = arith.mulf %8, %7 : vector<8x8xf32>
    %10 = vector.broadcast %4 : f32 to vector<8x8xf32>
    %11 = arith.addf %9, %10 : vector<8x8xf32>
    %12 = math.absf %11 : vector<8x8xf32>
    %cst_5 = arith.constant 0.000000e+00 : f32
    %13 = vector.broadcast %cst_5 : f32 to vector<8x8xf32>
    %14 = arith.subf %13, %12 : vector<8x8xf32>
    %15 = math.exp %14 : vector<8x8xf32>
    %16 = math.log1p %15 : vector<8x8xf32>
    %cst_6 = arith.constant 0.000000e+00 : f32
    %17 = vector.broadcast %cst_6 : f32 to vector<8x8xf32>
    %18 = arith.maximumf %11, %17 : vector<8x8xf32>
    %19 = arith.addf %16, %18 : vector<8x8xf32>
    %20 = tpu.iota {dimensions = array<i32: 0>} : vector<8x8xi32>
    %21 = tpu.iota {dimensions = array<i32: 1>} : vector<8x8xi32>
    %22 = arith.cmpi eq, %20, %21 : vector<8x8xi32>
    %23 = arith.extui %22 : vector<8x8xi1> to vector<8x8xi32>
    %24 = arith.sitofp %23 : vector<8x8xi32> to vector<8x8xf32>
    %25 = arith.cmpi eq, %arg0, %arg1 : i32
    %26 = arith.extui %25 : i1 to i32
    %27 = arith.sitofp %26 : i32 to f32
    %28 = vector.broadcast %27 : f32 to vector<8x8xf32>
    %29 = arith.mulf %24, %28 : vector<8x8xf32>
    %30 = arith.mulf %29, %11 : vector<8x8xf32>
    %31 = arith.subf %19, %30 : vector<8x8xf32>
    %c0_7 = arith.constant 0 : index
    %c0_8 = arith.constant 0 : index
    %32 = vector.load %arg6[%c0_7, %c0_8] : memref<8x8xf32, #tpu.memory_space<vmem>>, vector<8x8xf32>
    %33 = arith.addf %32, %31 : vector<8x8xf32>
    %c0_9 = arith.constant 0 : index
    %c0_10 = arith.constant 0 : index
    %34 = vector.load %arg6[%c0_9, %c0_10] : memref<8x8xf32, #tpu.memory_space<vmem>>, vector<8x8xf32>
    tpu.vector_store %arg6[%c0_9, %c0_10], %33 {strides = array<i32>} : memref<8x8xf32, #tpu.memory_space<vmem>>, vector<8x8xf32>,
    %c1_i32 = arith.constant 1 : i32
    %35 = arith.cmpi eq, %arg1, %c1_i32 : i32
    %36 = arith.extui %35 : i1 to i32
    %c0_i32_11 = arith.constant 0 : i32
    %37 = arith.cmpi ne, %36, %c0_i32_11 : i32
    scf.if %37 {
      %c0_12 = arith.constant 0 : index
      %c0_13 = arith.constant 0 : index
      %38 = vector.load %arg6[%c0_12, %c0_13] : memref<8x8xf32, #tpu.memory_space<vmem>>, vector<8x8xf32>
      %39 = vector.shape_cast %38 : vector<8x8xf32> to vector<1x8x8xf32>
      %cst_14 = arith.constant dense<0.000000e+00> : vector<8x8xf32>
      %40 = vector.multi_reduction <add>, %39, %cst_14 [0] : vector<1x8x8xf32> to vector<8x8xf32>
      %c0_15 = arith.constant 0 : index
      %c0_16 = arith.constant 0 : index
      %41 = vector.load %arg5[%c0_15, %c0_16] : memref<8x8xf32, #tpu.memory_space<vmem>>, vector<8x8xf32>
      tpu.vector_store %arg5[%c0_15, %c0_16], %40 {strides = array<i32>} : memref<8x8xf32, #tpu.memory_space<vmem>>, vector<8x8xf32>,
    } else {
    }
    return
  }
  func.func @transform_0(%arg0: i32, %arg1: i32, %arg2: memref<2xf32, #tpu.memory_space<smem>>) -> (i32, i32) {
    %c0_i32 = arith.constant 0 : i32
    %c0_i32_0 = arith.constant 0 : i32
    return %arg0, %c0_i32 : i32, i32
  }
  func.func @transform_1(%arg0: i32, %arg1: i32, %arg2: memref<2xf32, #tpu.memory_space<smem>>) -> (i32, i32) {
    %c0_i32 = arith.constant 0 : i32
    %c0_i32_0 = arith.constant 0 : i32
    return %arg1, %c0_i32 : i32, i32
  }
  func.func @transform_2(%arg0: i32, %arg1: i32, %arg2: memref<2xf32, #tpu.memory_space<smem>>) -> (i32, i32) {
    %c0_i32 = arith.constant 0 : i32
    %c0_i32_0 = arith.constant 0 : i32
    return %arg0, %c0_i32 : i32, i32
  }
}

</mosaic_0001>

<bundles_post_ra>
// kernel: tpu_custom_call.1
= control target key start
LH: loop header
LB: loop body
LE: loop exit
PB: predicated region body
PF: predicated region fallthrough
CT: control target
= control target key end

     0   :  { %s1041_s0 = inlined_call_operand.hbm [shape: f32[2], index: 0, kind: input, shape index: {}]   ;;  %s1042_s1 = inlined_call_operand.hbm [shape: f32[16,32], index: 1, kind: input, shape index: {}]   ;;  %s1043_s2 = inlined_call_operand.hbm [shape: f32[16,32], index: 2, kind: input, shape index: {}]   ;;  %s1044_s3 = inlined_call_operand.vmem [shape: f32[16,8], index: 3, kind: output, shape index: {}]  }
   0x1   :  { %s578_s14 = scalar_lea.hbm %s1041_s0, 16 }
   0x2   :  { %p579_p0 = scmp.ne.s32.totalorder %s1041_s0, %s578_s14  ;;  %p582_p1 = scmp.lt.u32.totalorder %s578_s14, %s1041_s0 }
   0x4   :  { %p584_p2 = pnand %p582_p1, %p579_p0 }
   0x6   :  { %587 = shalt.err (!%p584_p2)  }
   0x7   :  { %s746_s19 = smov [#allocation4]  }
   0x8   :  { %9 = dma.hbm_to_smem %s1041_s0, 16, %s746_s19, [#allocation3] }
   0x9   :  { %692 = dma.done.wait [#allocation3], 16 }
   0xa   :  { %693 = vsyncadd [#allocation3], 4294967280 }
   0xb   :  { %11 = sfence }
   0xc   :  { %12 = vsyncpa [#allocation6], 0 }
   0xd   :  { %14 = vsyncpa [#allocation6 + $0x1], 0 }
   0xe   :  { %15 = vsyncpa [#allocation8], 0 }
   0xf   :  { %17 = vsyncpa [#allocation8 + $0x1], 0  ;;  %s784_s22 = smov 0   ;;  %s786_s23 = smov 0  }
  0x10   :  { %s788_s24 = smov 0   ;;  %s790_s25 = smov 0  }
  0x11   :  { %s792_s26 = smov 0   ;;  %s794_s27 = smov 0  }
  0x12   :  { %s796_s0 = smov 0   ;;  %s798_s28 = smov 0  }
  0x13   :  { %s800_s29 = smov 0   ;;  %s802_s30 = smov 0  }
  0x14   :  { %s804_s4 = smov 0  }
  0x15 LB: > { %s443_s5 = sadd.s32 4294967295, %s744_s4   ;;  %s35_s6 = sadd.s32 1, %s740_s30  ;;  %s744_s4 = sphi %s804_s4, %s23_s4   ;;  %s740_s30 = sphi %s802_s30, %s1071_s30   ;;  %s736_s29 = sphi %s800_s29, %s1070_s29   ;;  %s732_s28 = sphi %s798_s28, %s1069_s28   ;;  %s728_s0 = sphi %s796_s0, %s1068_s0   ;;  %s724_s27 = sphi %s794_s27, %s1067_s27   ;;  %s720_s26 = sphi %s792_s26, %s1066_s26   ;;  %s716_s25 = sphi %s790_s25, %s1065_s25   ;;  %s712_s24 = sphi %s788_s24, %s1064_s24   ;;  %s708_s23 = sphi %s786_s23, %s1063_s23   ;;  %s704_s22 = sphi %s784_s22, %s1062_s22  }
  0x16   : > { %p49_p3 = scmp.ne.s32.totalorder %s724_s27, %s720_s26  ;;  %p1046_p4 = scmp.eq.s32.totalorder %s744_s4, 0 }
  0x17   : > { %p55_p5 = scmp.ne.s32.totalorder %s720_s26, %s716_s25  ;;  %p843_p6 = scmp.eq.s32.totalorder %s443_s5, 0 }
  0x18   : > { %p51_p7 = por %p1046_p4, %p49_p3  ;;  %p1045_p8 = scmp.lt.s32.totalorder %s744_s4, 4 }
  0x19   : > { %p852_p9 = por %p843_p6, %p55_p5  ;;  %s131_s9 = sand.u32 1, %s724_s27  }
  0x1a   : > { %s447_s10 = sshll.u32 %s131_s9, 3  ;;  %s448_s11 = sshll.u32 %s740_s30, 7 }
  0x1b   : > { %s1050_s8 = scalar_select %p852_p9, 1, 0 }
  0x1c   : > { %s861_s14 = scalar_lea.hbm %s1042_s1, %s448_s11  ;;  %s135_s15 = scalar_lea.vmem [#allocation5], %s447_s10 }
  0x1d   : > { %s142_s16 = sshll.u32 %s135_s15, 4  ;;  %p867_p10 = pnand %p1045_p8, %p51_p7  ;;  %s863_s16 = int_to_ptr.vmem [resolvable:$true] %s142_s16 }
  0x1e   : > { %s132_s18 = scalar_lea.sflag [#allocation6], %s131_s9  ;;  %s588_s19 = scalar_lea.hbm %s861_s14, 128 }
  0x1f   : > { %p589_p13 = scmp.ne.s32.totalorder %s861_s14, %s588_s19  ;;  %p590_p0 = pneg %p867_p10 }
  0x20   : > { %s593_s25 = scalar_lea.hbm %s1042_s1, 256  ;;  %p594_p3 = scmp.lt.u32.totalorder %s861_s14, %s1042_s1 }
  0x21   : > { %p591_p1 = pnand %p590_p0, %p589_p13  ;;  %p595_p5 = scmp.lt.u32.totalorder %s593_s25, %s588_s19 }
  0x22   : > { %p597_p8 = scmp.lt.u32.totalorder %s588_s19, %s861_s14 }
  0x23   : > { %p592_p2 = pneg %p591_p1  ;;  %p596_p7 = por %p595_p5, %p594_p3 }
  0x25   : > { %p598_p4 = por %p597_p8, %p596_p7 }
  0x27   : > { %p599_p11 = pnand %p598_p4, %p592_p2 }
  0x29   : > { %602 = shalt.err (!%p599_p11)
}
  0x2a   : > { %s603_s9 = scalar_lea.vmem %s863_s16, 128  ;;  %s747_s11 = smov [#allocation5]  }
  0x2b   : > { %p604_p13 = scmp.ne.s32.totalorder %s863_s16, %s603_s9  ;;  %s608_s12 = sshll.u32 %s747_s11, 4  ;;  %s609_s12 = int_to_ptr.vmem [resolvable:$false] %s608_s12 }
  0x2c   : > { %s610_s13 = scalar_lea.vmem %s609_s12, 256  ;;  %p611_p9 = scmp.lt.s32.totalorder %s863_s16, %s609_s12 }
  0x2d   : > { %p606_p1 = pnand %p604_p13, %p590_p0  ;;  %p612_p3 = scmp.lt.s32.totalorder %s610_s13, %s603_s9 }
  0x2f   : > { %p607_p12 = pneg %p606_p1  ;;  %p613_p5 = por %p612_p3, %p611_p9 }
  0x31   : > { %p614_p8 = pnand %p613_p5, %p607_p12 }
  0x33   : > { %617 = shalt.err (!%p614_p8)
}
  0x34   : > { %477 = dma.hbm_to_vmem [thread:$0]  (!%p867_p10), %s861_s14, 128, %s863_s16, %s132_s18  }
  0x35   : > { %p1052_p4 = scmp.lt.s32.totalorder %s744_s4, 5  ;;  %p1053_p9 = scmp.ge.s32.totalorder %s744_s4, 1 }
  0x36   : > { %s42_s17 = sadd.s32 1, %s724_s27  ;;  %s32_s19 = sadd.s32 1, %s736_s29 }
  0x37   : > { %p902_p11 = pnand %p1053_p9, %p1052_p4  ;;  %p33_p12 = scmp.ge.s32.totalorder %s32_s19, 2 }
  0x38   : > { %s68_s20 = sadd.s32 1, %s712_s24  ;;  %p75_p0 = scmp.ne.s32.totalorder %s712_s24, %s708_s23 }
  0x39   : > { %p81_p2 = scmp.ne.s32.totalorder %s708_s23, %s704_s22  ;;  %s1073_s19 = smov (%p33_p12, %s32_s19), 0 }
  0x3a   : > { %s1075_s6 = smov (!%p33_p12, %s35_s6), %s740_s30  ;;  %s65_s14 = ssub.s32 %s736_s29, %s1073_s19 }
  0x3b   : > { %s149_s16 = sand.u32 1, %s712_s24   ;;  %p37_p10 = scmp.ge.s32.totalorder %s1075_s6, 2 }
  0x3c   : > { %p66_p7 = scmp.eq.s32.totalorder %s65_s14, 0  ;;  %p1055_p13 = scmp.eq.s32.totalorder %s744_s4, 0 }
  0x3d   : > { %p929_p3 = por %p81_p2, %p843_p6  ;;  %s1077_s6 = smov (%p37_p10, %s1075_s6), 0 }
  0x3e   : > { %p923_p1 = por %p75_p0, %p1055_p13  ;;  %s39_s25 = ssub.s32 %s740_s30, %s1077_s6 }
  0x3f   : > { %s1057_s22 = scalar_select %p929_p3, 1, 0 }
  0x40   : > { %s936_s21 = scalar_select %p66_p7, %s712_s24, %s68_s20  }
  0x41   : > { %s449_s5 = sshll.u32 %s149_s16, 3  ;;  %p40_p5 = scmp.eq.s32.totalorder %s39_s25, 0 }
  0x42   : > { %s450_s10 = sshll.u32 %s736_s29, 7  ;;  %s153_s9 = scalar_lea.vmem [#allocation7], %s449_s5 }
  0x43   : > { %s160_s11 = sshll.u32 %s153_s9, 4  ;;  %s947_s14 = scalar_lea.hbm %s1043_s2, %s450_s10  ;;  %s949_s11 = int_to_ptr.vmem [resolvable:$true] %s160_s11 }
  0x44   : > { %s942_s12 = scalar_select %p40_p5, %s724_s27, %s42_s17  }
  0x45   : > { %p1058_p6 = scmp.lt.s32.totalorder %s744_s4, 4  ;;  %s150_s17 = scalar_lea.sflag [#allocation8], %s149_s16 }
  0x46   : > { %s618_s25 = scalar_lea.hbm %s947_s14, 128  ;;  %s623_s18 = scalar_lea.hbm %s1043_s2, 256 }
  0x47   : > { %p955_p8 = pnand %p1058_p6, %p923_p1  ;;  %p619_p4 = scmp.ne.s32.totalorder %s947_s14, %s618_s25 }
  0x48   : > { %p624_p2 = scmp.lt.u32.totalorder %s947_s14, %s1043_s2  ;;  %p625_p10 = scmp.lt.u32.totalorder %s623_s18, %s618_s25 }
  0x49   : > { %p620_p9 = pneg %p955_p8  ;;  %p627_p13 = scmp.lt.u32.totalorder %s618_s25, %s947_s14 }
  0x4a   : > { %p626_p7 = por %p625_p10, %p624_p2 }
  0x4b   : > { %p621_p12 = pnand %p620_p9, %p619_p4 }
  0x4c   : > { %p628_p1 = por %p627_p13, %p626_p7 }
  0x4d   : > { %p622_p0 = pneg %p621_p12 }
  0x4f   : > { %p629_p5 = pnand %p628_p1, %p622_p0 }
  0x51   : > { %632 = shalt.err (!%p629_p5)
}
  0x52   : > { %s633_s16 = scalar_lea.vmem %s949_s11, 128  ;;  %s748_s7 = smov [#allocation7]  }
  0x53   : > { %p634_p6 = scmp.ne.s32.totalorder %s949_s11, %s633_s16  ;;  %s638_s5 = sshll.u32 %s748_s7, 4  ;;  %s639_s5 = int_to_ptr.vmem [resolvable:$false] %s638_s5 }
  0x54   : > { %s640_s10 = scalar_lea.vmem %s639_s5, 256  ;;  %p641_p3 = scmp.lt.s32.totalorder %s949_s11, %s639_s5 }
  0x55   : > { %p636_p4 = pnand %p634_p6, %p620_p9  ;;  %p642_p2 = scmp.lt.s32.totalorder %s640_s10, %s633_s16 }
  0x57   : > { %p637_p12 = pneg %p636_p4  ;;  %p643_p10 = por %p642_p2, %p641_p3 }
  0x59   : > { %p644_p7 = pnand %p643_p10, %p637_p12 }
  0x5b   : > { %647 = shalt.err (!%p644_p7)
}
  0x5c   : > { %480 = dma.hbm_to_vmem [thread:$0]  (!%p955_p8), %s947_s14, 128, %s949_s11, %s150_s17  }
  0x5d   : > { %169 = sbr.rel (%p902_p11) target bundleno = 384 (0x180), region = 28  ;;  %s171_s25 = sand.u32 (!%p902_p11), 1, %s720_s26  }
  0x5e   : > { %s452_s18 = sshll.u32 (!%p902_p11), %s171_s25, 3  ;;  %s172_s9 = scalar_lea.sflag (!%p902_p11), [#allocation6], %s171_s25 }
  0x5f   : > { %s175_s13 = scalar_lea.vmem (!%p902_p11), [#allocation5], %s452_s18  ;;  %p1060_p9 = scmp.ne.s32.totalorder (!%p902_p11), %s1050_s8, 0 }
  0x64   : > { %695 = dma.done.wait (%p1060_p9), %s172_s9, 128  }
  0x65   : > { %697 = vsyncadd (%p1060_p9), %s172_s9, 4294967168  ;;  %s180_s20 = sand.u32 1, %s708_s23   ;;  %p1061_p3 = scmp.ne.s32.totalorder %s1057_s22, 0 }
  0x66   : > { %s453_s16 = sshll.u32 %s180_s20, 3  ;;  %s181_s7 = scalar_lea.sflag [#allocation8], %s180_s20 }
  0x67   : > { %s184_s11 = scalar_lea.vmem [#allocation7], %s453_s16 }
  0x68   : > { %699 = dma.done.wait (%p1061_p3), %s181_s7, 128  }
  0x69   : > { %701 = vsyncadd (%p1061_p3), %s181_s7, 4294967168  ;;  %p209_p11 = scmp.lt.s32.totalorder %s732_s28, 1  ;;  %p455_p8 = scmp.ne.s32.totalorder %s728_s0, 0 }
  0x6a   : > { %vm217_vm0 = vcmask (!%p455_p8), 64512   ;;  %v749_v0 = vmov (!%p455_p8), 0.0  }
  0x6b   : > { %s210_s15 = scalar_select %p209_p11, %s732_s28, 1 }
  0x6c   : > { %216 = sbr.rel (%p455_p8) target bundleno = 115 (0x73), region = 40  ;;  %218 = vst.msk [vmem:[#allocation2] sm:$0xff] (!%p455_p8), %vm217_vm0, %v749_v0 }
  0x6d   : > { %s454_s14 = sshll.u32 %s210_s15, 3 }
  0x6e   : > { %s1001_s8 = scalar_lea.vmem %s1044_s3, %s454_s14 }
  0x73 PF: > { %v222_v1 = vld [vmem:[%s184_s11] sm:$0xff]  ;;  %vm223_vm1 = vcmask 261120   ;;  %v750_v2 = vmov 0.0   ;;  %vm751_vm2 = vmmov 0   ;;  %v221_v3 = vld [vmem:[%s175_s13] sm:$0xff]  ;;  %p326_p0 = scmp.eq.s32.totalorder %s732_s28, %s728_s0  ;;  %v319_v4 = vlaneseq  ;;  %s219_s22 = sld [smem:[#allocation4]] }
  0x74   : > { %465 = vmatprep.subr.mxu0 %v750_v2  ;;  %467 = vmatprep.mubr.msk.f32.mxu0 %vm751_vm2, %v750_v2  ;;  %s456_s25 = sld [smem:[#allocation4 + $0x1]]  ;;  %v333_v31 = vld [vmem:[#allocation2] sm:$0xff]  ;;  %vm335_vm5 = vcmask 64512   ;;  %p460_p13 = scmp.ne.s32.totalorder %s728_s0, 1 }
  0x75   : > { %466 = vmatpush3.xpose.msk.msra.mxu0 %vm223_vm1, %v222_v1  ;;  %s327_s10 = scalar_select %p326_p0, 1, 0  ;;  %v320_v5 = vshrl.u32 %v319_v4, 7  ;;  %v322_v6 = vand.u32 127, %v319_v4 }
  0x77   : > { %s328_s18 = scvt.s32.f32 %s327_s10  ;;  %vm323_vm3 = vcmp.eq.s32.totalorder %v320_v5, %v322_v6 }
  0x78   : > { %468 = vmatmul.mubr.msk.f32.vlgmr.msra.gmra.mrb[0].mxu0 %vm223_vm1, %v221_v3  ;;  %v459_v7 = vsel %vm323_vm3, 1.0, %v750_v2 }
  0x79   : > { %v329_v8 = vstv %s328_s18  ;;  %v300_v9 = vstv %s219_s22 }
  0x7a   : > { %v302_v11 = vstv %s456_s25  ;;  %v330_v12 = vmul.f32 %v459_v7, %v329_v8 }
 0x14b   : > { %v296_v10 = vpop.f32.mrb[0].mxu0 }
 0x14c   : > { %v301_v13 = vmul.f32 %v300_v9, %v296_v10  ;;  %v469_v14 = vpop.f32.mrb[1].mxu0 }
 0x14e   : > { %v303_v15 = vadd.f32 %v302_v11, %v301_v13 }
 0x150   : > { %v304_v16 = vand.u32 2147483647, %v303_v15  ;;  %v331_v17 = vmul.f32 %v330_v12, %v303_v15  ;;  %v317_v28 = vmax.f32 %v303_v15, 0.0 }
 0x152   : > { %v305_v18 = vsub.f32 0.0, %v304_v16 }
 0x154   : > { %v306_v19 = vmul.f32 1.442695, %v305_v18 }
 0x156   : > { %574 = vpow2.f32 %v306_v19 }
 0x160   : > { %v575_v20 = vpop.eup %574 }
 0x161   : > { %v308_v21 = vadd.f32 1.0, %v575_v20  ;;  %v311_v22 = vmul.f32 -0.5, %v575_v20  ;;  %v314_v24 = vand.u32 2147483647, %v575_v20 }
 0x163   : > { %576 = vlog2.f32 %v308_v21  ;;  %v312_v23 = vadd.f32 1.0, %v311_v22  ;;  %vm315_vm4 = vcmp.lt.f32.partialorder %v314_v24, 0.0004427343 }
 0x165   : > { %v313_v27 = vmul.f32 %v575_v20, %v312_v23 }
 0x16d   : > { %v577_v25 = vpop.eup %576 }
 0x16e   : > { %v310_v26 = vmul.f32 0.6931472, %v577_v25 }
 0x170   : > { %v316_v29 = vsel %vm315_vm4, %v313_v27, %v310_v26 }
 0x171   : > { %v318_v30 = vadd.f32 %v317_v28, %v316_v29  ;;  %340 = sbr.rel (%p460_p13) target bundleno = 384 (0x180), region = 44 }
 0x173   : > { %v332_v32 = vsub.f32 %v318_v30, %v331_v17 }
 0x175   : > { %v334_v33 = vadd.f32 %v333_v31, %v332_v32 }
 0x177   : > { %336 = vst.msk [vmem:[#allocation2] sm:$0xff] %vm335_vm5, %v334_v33 }
 0x17e   : > { %v341_v34 = vld [vmem:[#allocation2] sm:$0xff] }
 0x17f   : > { %343 = vst.msk [vmem:[%s1001_s8] sm:$0xff] %vm335_vm5, %v341_v34 }
 0x180 PF: > { %s23_s4 = sadd.s32 1, %s744_s4   ;;  %s1062_s22 = smov %s708_s23 }
 0x181   : > { %p20_p1 = scmp.ge.s32.totalorder %s23_s4, 6   ;;  %s1063_s23 = smov %s712_s24 }
 0x182   : > { %s1064_s24 = smov %s936_s21  ;;  %s1065_s25 = smov %s720_s26 }
 0x183   : > { %s1066_s26 = smov %s724_s27  ;;  %s1067_s27 = smov %s942_s12 }
 0x184   : > { %s1068_s0 = smov %s736_s29  ;;  %s1069_s28 = smov %s740_s30 }
 0x185   : > { %s1070_s29 = smov %s1073_s19  ;;  %s1071_s30 = smov %s1077_s6 }
 0x186   :  { %22 = sbr.rel (!%p20_p1) target bundleno = 21 (0x15), region = 89 }
 0x18d   :  { %363 = vsyncpa [#allocation6], 1 }
 0x18e   :  { %365 = vsyncpa [#allocation6 + $0x1], 1 }
 0x18f   :  { %366 = vsyncpa [#allocation8], 1 }
 0x190   :  { %368 = vsyncpa [#allocation8 + $0x1], 1 }

</bundles_post_ra>
